<compile_context>
chip_gen: v7x
topology: tpu7x:2x2x1
jax: 0.10.0
libtpu: 0.0.40
codegen_flags: <defaults>
</compile_context>

<pallas_src>
import jax
import jax.numpy as jnp
from jax.experimental import pallas as pl
from jax.experimental.pallas import tpu as pltpu


def attention_kernel(x_ref, w_th_ref, b_th_ref, w_dec_ref, b_dec_ref, out_ref):
    x = x_ref[...]                                    # [TB, S, E]
    w_row = w_th_ref[...].reshape(1, 1, -1)           # [1, 1, E]

    # f_theta: scores[b, s] = sum_e x[b, s, e] * w[e] + b_theta    -> [TB, S, 1]
    scores = jnp.sum(x * w_row, axis=2, keepdims=True) + b_th_ref[0]

    # softmax over the sequence axis (torch nn.Softmax(dim=1) on [B, S, 1])
    m = jnp.max(scores, axis=1, keepdims=True)        # [TB, 1, 1]
    e = jnp.exp(scores - m)
    denom = jnp.sum(e, axis=1, keepdims=True)         # [TB, 1, 1]
    probas = e * pl.reciprocal(denom, approx=False)   # [TB, S, 1]

    # attention pooling: y_embed = (probas * x).sum(dim=1)          -> [TB, E]
    y = jnp.sum(probas * x, axis=1)

    # decoder: [TB, E] @ [E, C] + [1, C]   (lane-dense row output)  -> [TB, C]
    out_ref[...] = (
        jnp.dot(y, w_dec_ref[...], preferred_element_type=jnp.float32)
        + b_dec_ref[...]
    )


def attention_forward(x, w_theta, b_theta, w_dec, b_dec, *, block_b=8):
    B, S, E = x.shape
    C = w_dec.shape[0]
    if B % block_b != 0 or (block_b % 8 != 0 and block_b != B):
        block_b = B                      # fall back to one block for odd sizes
    grid = (B // block_b,)

    w_th_row = jnp.asarray(w_theta, jnp.float32).reshape(1, E)    # [1, E] row
    b_th = jnp.asarray(b_theta, jnp.float32).reshape(1)           # SMEM scalar
    w_dec_t = jnp.asarray(w_dec, jnp.float32).T                   # [E, C]
    b_dec_row = jnp.asarray(b_dec, jnp.float32).reshape(1, C)     # [1, C] row

    cost = pl.CostEstimate(
        flops=4 * B * S * E + 2 * B * E * C,
        transcendentals=B * S,
        bytes_accessed=4 * (B * S * E + E + 1 + E * C + C + B * C),
    )

    return pl.pallas_call(
        attention_kernel,
        grid=grid,
        in_specs=[
            pl.BlockSpec((block_b, S, E), lambda i: (i, 0, 0)),     # x tile
            pl.BlockSpec((1, E), lambda i: (0, 0)),                 # f_theta weight row
            pl.BlockSpec(memory_space=pltpu.MemorySpace.SMEM),      # f_theta bias scalar
            pl.BlockSpec((E, C), lambda i: (0, 0)),                 # decoder weight [E, C]
            pl.BlockSpec((1, C), lambda i: (0, 0)),                 # decoder bias row
        ],
        out_specs=pl.BlockSpec((block_b, C), lambda i: (i, 0)),
        out_shape=jax.ShapeDtypeStruct((B, C), jnp.float32),
        compiler_params=pltpu.CompilerParams(
            dimension_semantics=("parallel",)),
        cost_estimate=cost,
    )(x, w_th_row, b_th, w_dec_t, b_dec_row)


def reference_forward(x, w_theta, b_theta, w_dec, b_dec):
    # Pure-JAX mirror of the torch forward (for correctness check).
    l1 = x @ w_theta.T + b_theta              # [B, S, 1]
    probas = jax.nn.softmax(l1, axis=1)       # softmax over the sequence axis
    y_embed = (probas * x).sum(axis=1)        # [B, E]
    return y_embed @ w_dec.T + b_dec          # [B, C]


if __name__ == "__main__":
    batch, seq_len, embedding_size, classes = 16, 16, 32, 8

    key = jax.random.PRNGKey(0)
    kx, k1, k2, k3, k4 = jax.random.split(key, 5)

    def init_linear(kw, kb, fan_in, fan_out):
        bound = 1.0 / (fan_in ** 0.5)
        w = jax.random.uniform(kw, (fan_out, fan_in), jnp.float32, -bound, bound)
        b = jax.random.uniform(kb, (fan_out,), jnp.float32, -bound, bound)
        return w, b

    w_theta, b_theta = init_linear(k1, k2, embedding_size, 1)        # [1, E], [1]
    w_dec, b_dec = init_linear(k3, k4, embedding_size, classes)      # [C, E], [C]

    # x is [batch, seq, embedding]; nn.Softmax(dim=1) = softmax over the seq axis.
    x = jax.random.normal(kx, (batch, seq_len, embedding_size), jnp.float32)

    out = attention_forward(x, w_theta, b_theta, w_dec, b_dec, block_b=8)
    out = jax.block_until_ready(out)

    ref = reference_forward(x, w_theta, b_theta, w_dec, b_dec)
    assert out.shape == (batch, classes), out.shape
    assert jnp.allclose(out, ref, atol=1e-4, rtol=1e-4), (out, ref)

    print("KERNEL_OK")
</pallas_src>

<mosaic_0001>
module attributes {stable_mosaic.version = 11 : i64} {
  func.func @attention_kernel(%arg0: i32, %arg1: memref<8x16x32xf32, #tpu.memory_space<vmem>>, %arg2: memref<1x32xf32, #tpu.memory_space<vmem>>, %arg3: memref<1xf32, #tpu.memory_space<smem>>, %arg4: memref<32x8xf32, #tpu.memory_space<vmem>>, %arg5: memref<1x8xf32, #tpu.memory_space<vmem>>, %arg6: memref<8x8xf32, #tpu.memory_space<vmem>>) attributes {dimension_semantics = [#tpu.dimension_semantics<parallel>], iteration_bounds = array<i64: 2>, scalar_prefetch = 0 : i64, scratch_operands = 0 : i64, tpu.core_type = #tpu.core_type<tc>, window_params = [{transform_indices = @transform_0, window_bounds = array<i64: 8, 16, 32>}, {pipeline_mode = #tpu.pipeline_mode<synchronous>, transform_indices = @transform_1, window_bounds = array<i64: 1, 32>}, {transform_indices = @transform_2, window_bounds = array<i64: 1>}, {pipeline_mode = #tpu.pipeline_mode<synchronous>, transform_indices = @transform_3, window_bounds = array<i64: 32, 8>}, {pipeline_mode = #tpu.pipeline_mode<synchronous>, transform_indices = @transform_4, window_bounds = array<i64: 1, 8>}, {transform_indices = @transform_5, window_bounds = array<i64: 8, 8>}]} {
    %c0 = arith.constant 0 : index
    %c0_0 = arith.constant 0 : index
    %c0_1 = arith.constant 0 : index
    %0 = vector.load %arg1[%c0, %c0_0, %c0_1] : memref<8x16x32xf32, #tpu.memory_space<vmem>>, vector<8x16x32xf32>
    %c0_2 = arith.constant 0 : index
    %c0_3 = arith.constant 0 : index
    %1 = vector.load %arg2[%c0_2, %c0_3] : memref<1x32xf32, #tpu.memory_space<vmem>>, vector<1x32xf32>
    %2 = vector.shape_cast %1 : vector<1x32xf32> to vector<1x1x32xf32>
    %3 = vector.broadcast %2 : vector<1x1x32xf32> to vector<8x16x32xf32>
    %4 = arith.mulf %0, %3 : vector<8x16x32xf32>
    %cst = arith.constant dense<0.000000e+00> : vector<8x16xf32>
    %5 = vector.multi_reduction <add>, %4, %cst [2] : vector<8x16x32xf32> to vector<8x16xf32>
    %6 = vector.shape_cast %5 : vector<8x16xf32> to vector<8x16x1xf32>
    %c0_4 = arith.constant 0 : index
    %7 = memref.load %arg3[%c0_4] : memref<1xf32, #tpu.memory_space<smem>>
    %8 = vector.broadcast %7 : f32 to vector<8x16x1xf32>
    %9 = arith.addf %6, %8 : vector<8x16x1xf32>
    %cst_5 = arith.constant dense<0xFF800000> : vector<8x1xf32>
    %10 = vector.multi_reduction <maximumf>, %9, %cst_5 [1] : vector<8x16x1xf32> to vector<8x1xf32>
    %11 = vector.shape_cast %10 : vector<8x1xf32> to vector<8x1x1xf32>
    %12 = vector.broadcast %11 : vector<8x1x1xf32> to vector<8x16x1xf32>
    %13 = arith.subf %9, %12 : vector<8x16x1xf32>
    %14 = math.exp %13 : vector<8x16x1xf32>
    %cst_6 = arith.constant dense<0.000000e+00> : vector<8x1xf32>
    %15 = vector.multi_reduction <add>, %14, %cst_6 [1] : vector<8x16x1xf32> to vector<8x1xf32>
    %16 = vector.shape_cast %15 : vector<8x1xf32> to vector<8x1x1xf32>
    %17 = tpu.reciprocal %16 : vector<8x1x1xf32> -> vector<8x1x1xf32>
    %18 = vector.broadcast %17 : vector<8x1x1xf32> to vector<8x16x1xf32>
    %19 = arith.mulf %14, %18 : vector<8x16x1xf32>
    %20 = vector.broadcast %19 : vector<8x16x1xf32> to vector<8x16x32xf32>
    %21 = arith.mulf %20, %0 : vector<8x16x32xf32>
    %cst_7 = arith.constant dense<0.000000e+00> : vector<8x32xf32>
    %22 = vector.multi_reduction <add>, %21, %cst_7 [1] : vector<8x16x32xf32> to vector<8x32xf32>
    %c0_8 = arith.constant 0 : index
    %c0_9 = arith.constant 0 : index
    %23 = vector.load %arg4[%c0_8, %c0_9] : memref<32x8xf32, #tpu.memory_space<vmem>>, vector<32x8xf32>
    %cst_10 = arith.constant dense<0.000000e+00> : vector<8x8xf32>
    %24 = tpu.matmul %22, %23, %cst_10 {dimension_numbers = #tpu.dot_dimension_numbers<[1], [0], [0], [1], [0, 0, 1, 1], [], []>} : vector<8x32xf32>, vector<32x8xf32>, vector<8x8xf32> -> vector<8x8xf32>
    %c0_11 = arith.constant 0 : index
    %c0_12 = arith.constant 0 : index
    %25 = vector.load %arg5[%c0_11, %c0_12] : memref<1x8xf32, #tpu.memory_space<vmem>>, vector<1x8xf32>
    %26 = vector.broadcast %25 : vector<1x8xf32> to vector<8x8xf32>
    %27 = arith.addf %24, %26 : vector<8x8xf32>
    %c0_13 = arith.constant 0 : index
    %c0_14 = arith.constant 0 : index
    %28 = vector.load %arg6[%c0_13, %c0_14] : memref<8x8xf32, #tpu.memory_space<vmem>>, vector<8x8xf32>
    tpu.vector_store %arg6[%c0_13, %c0_14], %27 {strides = array<i32>} : memref<8x8xf32, #tpu.memory_space<vmem>>, vector<8x8xf32>,
    return
  }
  func.func @transform_0(%arg0: i32) -> (i32, i32, i32) {
    %c0_i32 = arith.constant 0 : i32
    %c0_i32_0 = arith.constant 0 : i32
    %c0_i32_1 = arith.constant 0 : i32
    return %arg0, %c0_i32, %c0_i32_0 : i32, i32, i32
  }
  func.func @transform_1(%arg0: i32) -> (i32, i32) {
    %c0_i32 = arith.constant 0 : i32
    %c0_i32_0 = arith.constant 0 : i32
    %c0_i32_1 = arith.constant 0 : i32
    return %c0_i32, %c0_i32_0 : i32, i32
  }
  func.func @transform_2(%arg0: i32) -> i32 {
    %c0_i32 = arith.constant 0 : i32
    %c0_i32_0 = arith.constant 0 : i32
    return %c0_i32 : i32
  }
  func.func @transform_3(%arg0: i32) -> (i32, i32) {
    %c0_i32 = arith.constant 0 : i32
    %c0_i32_0 = arith.constant 0 : i32
    %c0_i32_1 = arith.constant 0 : i32
    return %c0_i32, %c0_i32_0 : i32, i32
  }
  func.func @transform_4(%arg0: i32) -> (i32, i32) {
    %c0_i32 = arith.constant 0 : i32
    %c0_i32_0 = arith.constant 0 : i32
    %c0_i32_1 = arith.constant 0 : i32
    return %c0_i32, %c0_i32_0 : i32, i32
  }
  func.func @transform_5(%arg0: i32) -> (i32, i32) {
    %c0_i32 = arith.constant 0 : i32
    %c0_i32_0 = arith.constant 0 : i32
    return %arg0, %c0_i32 : i32, i32
  }
}

</mosaic_0001>

<bundles_post_ra>
// kernel: tpu_custom_call.1
= control target key start
LH: loop header
LB: loop body
LE: loop exit
PB: predicated region body
PF: predicated region fallthrough
CT: control target
= control target key end

     0   :  { %s1399_s0 = inlined_call_operand.hbm [shape: f32[16,16,32], index: 0, kind: input, shape index: {}]   ;;  %s1400_s1 = inlined_call_operand.vmem [shape: f32[1,32], index: 1, kind: input, shape index: {}]   ;;  %s1401_s2 = inlined_call_operand.<no memory space> [shape: f32[1], index: 2, kind: input, shape index: {}]   ;;  %s1402_s3 = inlined_call_operand.vmem [shape: f32[32,8], index: 3, kind: input, shape index: {}]   ;;  %s1403_s4 = inlined_call_operand.vmem [shape: f32[1,8], index: 4, kind: input, shape index: {}]   ;;  %s1404_s5 = inlined_call_operand.vmem [shape: f32[16,8], index: 5, kind: output, shape index: {}]  }
   0x1   :  { %10 = sst [smem:[#allocation2]] %s1401_s2 }
   0x2   :  { %11 = vsyncpa [#allocation4], 0 }
   0x3   :  { %13 = vsyncpa [#allocation4 + $0x1], 0  ;;  %s1032_s20 = smov 0   ;;  %s1034_s21 = smov 0  }
   0x4   :  { %s1036_s22 = smov 0   ;;  %s1038_s23 = smov 0  }
   0x5 LB: > { %s1051_s2 = sadd.s32 4294967295, %s991_s23   ;;  %s1054_s24 = sadd.s32 1, %s991_s23   ;;  %s991_s23 = sphi %s1038_s23, %s1411_s23   ;;  %s987_s22 = sphi %s1036_s22, %s1410_s22   ;;  %s983_s21 = sphi %s1034_s21, %s1409_s21   ;;  %s979_s20 = sphi %s1032_s20, %s1408_s20  }
   0x6   : > { %s23_s25 = ssub.s32 %s991_s23, %s1054_s24  ;;  %s26_s26 = sadd.s32 1, %s987_s22 }
   0x7   : > { %p24_p0 = scmp.eq.s32.totalorder %s23_s25, 0  ;;  %p33_p1 = scmp.ne.s32.totalorder %s987_s22, %s983_s21 }
   0x8   : > { %p34_p2 = scmp.eq.s32.totalorder %s991_s23, 0  ;;  %p39_p3 = scmp.ne.s32.totalorder %s983_s21, %s979_s20 }
   0x9   : > { %s1064_s27 = scalar_select %p24_p0, %s987_s22, %s26_s26  }
   0xa   : > { %p35_p4 = por %p34_p2, %p33_p1  ;;  %p40_p5 = scmp.eq.s32.totalorder %s1051_s2, 0 }
   0xb   : > { %p841_p6 = scmp.lt.s32.totalorder %s991_s23, 2  ;;  %s185_s29 = sand.u32 1, %s987_s22  }
   0xc   : > { %p1068_p7 = por %p40_p5, %p39_p3  ;;  %s799_s30 = sshll.u32 %s185_s29, 7 }
   0xd   : > { %s812_s6 = sshll.u32 %s991_s23, 11  ;;  %s189_s10 = scalar_lea.vmem [#allocation3], %s799_s30 }
   0xe   : > { %s1077_s9 = scalar_lea.hbm %s1399_s0, %s812_s6  ;;  %s197_s11 = sshll.u32 %s189_s10, 4  ;;  %s1079_s11 = int_to_ptr.vmem [resolvable:$true] %s197_s11 }
   0xf   : > { %p1081_p8 = pnand %p841_p6, %p35_p4  ;;  %s1086_s13 = scalar_lea.sflag [#allocation4], %s185_s29 }
  0x10   : > { %s927_s14 = scalar_lea.hbm %s1077_s9, 2048  ;;  %s932_s17 = scalar_lea.hbm %s1399_s0, 4096 }
  0x11   : > { %p928_p10 = scmp.ne.s32.totalorder %s1077_s9, %s927_s14  ;;  %p929_p11 = pneg %p1081_p8 }
  0x12   : > { %p933_p0 = scmp.lt.u32.totalorder %s1077_s9, %s1399_s0  ;;  %p934_p1 = scmp.lt.u32.totalorder %s932_s17, %s927_s14 }
  0x13   : > { %p930_p12 = pnand %p929_p11, %p928_p10  ;;  %p936_p3 = scmp.lt.u32.totalorder %s927_s14, %s1077_s9 }
  0x14   : > { %p935_p2 = por %p934_p1, %p933_p0 }
  0x15   : > { %p931_p13 = pneg %p930_p12 }
  0x16   : > { %p937_p4 = por %p936_p3, %p935_p2 }
  0x18   : > { %p938_p5 = pnand %p937_p4, %p931_p13 }
  0x1a   : > { %941 = shalt.err (!%p938_p5)
}
  0x1b   : > { %s942_s20 = scalar_lea.vmem %s1079_s11, 2048  ;;  %s993_s25 = smov [#allocation3]  }
  0x1c   : > { %p943_p6 = scmp.ne.s32.totalorder %s1079_s11, %s942_s20  ;;  %s947_s26 = sshll.u32 %s993_s25, 4  ;;  %s948_s26 = int_to_ptr.vmem [resolvable:$false] %s947_s26 }
  0x1d   : > { %s949_s29 = scalar_lea.vmem %s948_s26, 4096  ;;  %p950_p9 = scmp.lt.s32.totalorder %s1079_s11, %s948_s26 }
  0x1e   : > { %p945_p10 = pnand %p943_p6, %p929_p11  ;;  %p951_p0 = scmp.lt.s32.totalorder %s949_s29, %s942_s20 }
  0x20   : > { %p946_p12 = pneg %p945_p10  ;;  %p952_p1 = por %p951_p0, %p950_p9 }
  0x22   : > { %p953_p2 = pnand %p952_p1, %p946_p12 }
  0x24   : > { %956 = shalt.err (!%p953_p2)
}
  0x25   : > { %s994_s30 = smov 128   ;;  %s995_s6 = smov 8  }
  0x26   : > { %840 = dma.hbm_to_vmem [thread:$0]  (!%p1081_p8), %s1077_s9, 2048, %s1079_s11, %s1086_s13, %s994_s30, %s994_s30, %s995_s6  }
  0x27   : > { %p205_p11 = scmp.lt.s32.totalorder %s991_s23, 3  ;;  %p1407_p13 = scmp.ge.s32.totalorder %s991_s23, 1 }
  0x29   : > { %p206_p3 = pnand %p1407_p13, %p205_p11 }
  0x2a   : > { %s211_s7 = sand.u32 (!%p206_p3), 1, %s983_s21  }
  0x2b   : > { %209 = sbr.rel (%p206_p3) target bundleno = 521 (0x209), region = 40  ;;  %s804_s8 = sshll.u32 (!%p206_p3), %s211_s7, 7 }
  0x2c   : > { %s212_s10 = scalar_lea.sflag (!%p206_p3), [#allocation4], %s211_s7  ;;  %s1118_s14 = scalar_lea.vmem (!%p206_p3), [#allocation3], %s804_s8 }
  0x32   : > { %974 = dma.done.wait (%p1068_p7), %s212_s10, 2048  }
  0x33   : > { %976 = vsyncadd (%p1068_p7), %s212_s10, 4294965248  ;;  %v1125_v0 = vld [vmem:[%s1118_s14 + $0x10] sm:$0xff]  ;;  %v806_v1 = vld [vmem:[%s1400_s1] ss:$0 sm:$0xff]  ;;  %vm285_vm0 = vcmask 261120   ;;  %v996_v52 = vmov 0.0|0.0  }
  0x34   : > { %v1131_v2 = vld [vmem:[%s1118_s14] sm:$0xff]  ;;  %v271_v3 = vmul.f32 %v806_v1, %v1125_v0  ;;  %v1136_v5 = vld [vmem:[%s1118_s14 + $0x18] sm:$0xff]  ;;  %v1139_v6 = vld [vmem:[%s1118_s14 + $0x8] sm:$0xff]  ;;  %829 = vmatprep.subr.bf16.mxu0 %v996_v52  ;;  %vm997_vm1 = vmmov 0   ;;  %v998_v55 = vmov 0.0   ;;  %s334_s19 = sld [smem:[#allocation2]] }
  0x35   : > { %v269_v4 = vmul.f32 %v806_v1, %v1131_v2  ;;  %v272_v7 = vmul.f32 %v806_v1, %v1136_v5  ;;  %v270_v8 = vmul.f32 %v806_v1, %v1139_v6  ;;  %v1144_v9 = vld [vmem:[%s1118_s14 + $0x28] sm:$0xff]  ;;  %v1147_v10 = vld [vmem:[%s1118_s14 + $0x20] sm:$0xff]  ;;  %v1156_v17 = vld [vmem:[%s1118_s14 + $0x38] sm:$0xff]  ;;  %826 = vmatprep.mubr.msk.f32.mxu0 %vm997_vm1, %v998_v55  ;;  %vm643_vm2 = vcmask 1041409   ;;  %p242_p7 = scmp.lt.s32.totalorder %s1051_s2, 1 }
  0x36   : > { %v292_v11 = vsel %vm285_vm0, %v271_v3, 0.0  ;;  %v274_v15 = vmul.f32 %v806_v1, %v1144_v9  ;;  %v273_v16 = vmul.f32 %v806_v1, %v1147_v10  ;;  %v1159_v18 = vld [vmem:[%s1118_s14 + $0x30] sm:$0xff]  ;;  %v276_v21 = vmul.f32 %v806_v1, %v1156_v17  ;;  %v1166_v23 = vld [vmem:[%s1118_s14 + $0x48] sm:$0xff]  ;;  %v1169_v24 = vld [vmem:[%s1118_s14 + $0x40] sm:$0xff] }
  0x37   : > { %v286_v12 = vsel %vm285_vm0, %v269_v4, 0.0  ;;  %293 = vadd.xlane.f32.xlu1 %v292_v11  ;;  %v295_v13 = vsel %vm285_vm0, %v272_v7, 0.0  ;;  %v289_v14 = vsel %vm285_vm0, %v270_v8, 0.0  ;;  %v275_v22 = vmul.f32 %v806_v1, %v1159_v18  ;;  %v1176_v29 = vld [vmem:[%s1118_s14 + $0x58] sm:$0xff]  ;;  %v1179_v30 = vld [vmem:[%s1118_s14 + $0x50] sm:$0xff]  ;;  %v1186_v35 = vld [vmem:[%s1118_s14 + $0x68] sm:$0xff] }
  0x38   : > { %287 = vadd.xlane.f32.xlu0 %v286_v12  ;;  %v301_v19 = vsel %vm285_vm0, %v274_v15, 0.0  ;;  %v298_v20 = vsel %vm285_vm0, %v273_v16, 0.0  ;;  %v307_v25 = vsel %vm285_vm0, %v276_v21, 0.0  ;;  %v278_v27 = vmul.f32 %v806_v1, %v1166_v23  ;;  %v1189_v36 = vld [vmem:[%s1118_s14 + $0x60] sm:$0xff]  ;;  %v1196_v41 = vld [vmem:[%s1118_s14 + $0x78] sm:$0xff]  ;;  %v1199_v42 = vld [vmem:[%s1118_s14 + $0x70] sm:$0xff] }
  0x39   : > { %v304_v26 = vsel %vm285_vm0, %v275_v22, 0.0  ;;  %v277_v28 = vmul.f32 %v806_v1, %v1169_v24  ;;  %v280_v33 = vmul.f32 %v806_v1, %v1176_v29  ;;  %v279_v34 = vmul.f32 %v806_v1, %v1179_v30  ;;  %v624_v49 = vld [vmem:[%s1402_s3] sm:$0xff]  ;;  %v625_v50 = vld [vmem:[%s1402_s3 + $0x8] sm:$0xff]  ;;  %v626_v51 = vld [vmem:[%s1402_s3 + $0x10] sm:$0xff]  ;;  %s1413_s2 = smov (!%p242_p7, %s1051_s2), 1 }
  0x3a   : > { %v313_v31 = vsel %vm285_vm0, %v278_v27, 0.0  ;;  %v282_v39 = vmul.f32 %v806_v1, %v1186_v35  ;;  %v281_v40 = vmul.f32 %v806_v1, %v1189_v36  ;;  %v284_v45 = vmul.f32 %v806_v1, %v1196_v41  ;;  %v627_v54 = vld [vmem:[%s1402_s3 + $0x18] sm:$0xff]  ;;  %s805_s20 = sshll.u32 %s1413_s2, 3 }
  0x3b   : > { %296 = vadd.xlane.f32.xlu1 %v295_v13  ;;  %v310_v32 = vsel %vm285_vm0, %v277_v28, 0.0  ;;  %v319_v37 = vsel %vm285_vm0, %v280_v33, 0.0  ;;  %v316_v38 = vsel %vm285_vm0, %v279_v34, 0.0  ;;  %v283_v46 = vmul.f32 %v806_v1, %v1199_v42  ;;  %s245_s6 = scalar_lea.vmem %s1404_s5, %s805_s20 }
  0x3c   : > { %290 = vadd.xlane.f32.xlu0 %v289_v14  ;;  %v325_v43 = vsel %vm285_vm0, %v282_v39, 0.0  ;;  %v322_v44 = vsel %vm285_vm0, %v281_v40, 0.0  ;;  %v331_v47 = vsel %vm285_vm0, %v284_v45, 0.0  ;;  %v830_v53 = vpack.c.bf16 %v625_v50, %v624_v49 }
  0x3d   : > { %v328_v48 = vsel %vm285_vm0, %v283_v46, 0.0  ;;  %v833_v56 = vpack.c.bf16 %v627_v54, %v626_v51  ;;  %v1219_v59 = vstv %s334_s19  ;;  %vm645_vm3 = vcmask 1042434  }
  0x3e   : > { %831 = vmatpush3.bf16.msra.mxu0 %v830_v53  ;;  %vm647_vm4 = vcmask 1043459   ;;  %vm649_vm5 = vcmask 1044484   ;;  %vm651_vm6 = vcmask 1045509   ;;  %vm653_vm7 = vcmask 1046534  }
  0x3f   : > { %302 = vadd.xlane.f32.xlu1 %v301_v19  ;;  %832 = vmatprep.subr.bf16.mxu0 %v996_v52  ;;  %vm655_vm8 = vcmask 1047559   ;;  %vm729_vm9 = vcmask 64512  }
  0x40   : > { %299 = vadd.xlane.f32.xlu0 %v298_v20 }
  0x42   : > { %834 = vmatpush3.bf16.msra.mxu0 %v833_v56 }
  0x43   : > { %308 = vadd.xlane.f32.xlu1 %v307_v25 }
  0x44   : > { %305 = vadd.xlane.f32.xlu0 %v304_v26 }
  0x47   : > { %314 = vadd.xlane.f32.xlu1 %v313_v31 }
  0x48   : > { %311 = vadd.xlane.f32.xlu0 %v310_v32 }
  0x4b   : > { %320 = vadd.xlane.f32.xlu1 %v319_v37 }
  0x4c   : > { %317 = vadd.xlane.f32.xlu0 %v316_v38 }
  0x4f   : > { %326 = vadd.xlane.f32.xlu1 %v325_v43 }
  0x50   : > { %323 = vadd.xlane.f32.xlu0 %v322_v44 }
  0x53   : > { %332 = vadd.xlane.f32.xlu1 %v331_v47 }
  0x54   : > { %329 = vadd.xlane.f32.xlu0 %v328_v48 }
  0xc4   : > { %v294_v57 = vpop.xlane.xlu1 %293 }
  0xc5   : > { %v288_v58 = vpop.xlane.xlu0 %287  ;;  %v338_v62 = vadd.f32 %v1219_v59, %v294_v57 }
  0xc6   : > { %v336_v63 = vadd.f32 %v1219_v59, %v288_v58 }
  0xc8   : > { %v297_v60 = vpop.xlane.xlu1 %296 }
  0xc9   : > { %v291_v61 = vpop.xlane.xlu0 %290  ;;  %v339_v1 = vadd.f32 %v1219_v59, %v297_v60 }
  0xca   : > { %v337_v3 = vadd.f32 %v1219_v59, %v291_v61 }
  0xcb   : > { %v359_v4 = vmax.f32 %v338_v62, %v339_v1 }
  0xcc   : > { %v352_v7 = vmax.f32 %v336_v63, %v337_v3  ;;  %v303_v8 = vpop.xlane.xlu1 %302 }
  0xcd   : > { %v300_v11 = vpop.xlane.xlu0 %299  ;;  %v360_v12 = vrot.slane %v359_v4, 4  ;;  %v1226_v14 = vadd.f32 %v1219_v59, %v303_v8 }
  0xce   : > { %v353_v13 = vrot.slane %v352_v7, 4  ;;  %v340_v15 = vadd.f32 %v1219_v59, %v300_v11 }
  0xcf   : > { %v361_v16 = vmax.f32 %v359_v4, %v360_v12 }
  0xd0   : > { %v354_v19 = vmax.f32 %v352_v7, %v353_v13  ;;  %v366_v20 = vmax.f32 %v340_v15, %v1226_v14  ;;  %v309_v21 = vpop.xlane.xlu1 %308 }
  0xd1   : > { %v306_v22 = vpop.xlane.xlu0 %305  ;;  %v362_v25 = vrot.slane %v361_v16, 2  ;;  %v1231_v28 = vadd.f32 %v1219_v59, %v309_v21 }
  0xd2   : > { %v355_v26 = vrot.slane %v354_v19, 2  ;;  %v367_v27 = vrot.slane %v366_v20, 4  ;;  %v1234_v31 = vadd.f32 %v1219_v59, %v306_v22 }
  0xd3   : > { %v363_v32 = vmax.f32 %v361_v16, %v362_v25 }
  0xd4   : > { %v356_v33 = vmax.f32 %v354_v19, %v355_v26  ;;  %v368_v34 = vmax.f32 %v366_v20, %v367_v27  ;;  %v373_v37 = vmax.f32 %v1234_v31, %v1231_v28  ;;  %v315_v38 = vpop.xlane.xlu1 %314 }
  0xd5   : > { %v312_v39 = vpop.xlane.xlu0 %311  ;;  %v364_v40 = vrot.slane %v363_v32, 1  ;;  %v1239_v45 = vadd.f32 %v1219_v59, %v315_v38 }
  0xd6   : > { %v357_v43 = vrot.slane %v356_v33, 1  ;;  %v369_v44 = vrot.slane %v368_v34, 2  ;;  %v374_v46 = vrot.slane %v373_v37, 4  ;;  %v1242_v47 = vadd.f32 %v1219_v59, %v312_v39 }
  0xd7   : > { %v365_v48 = vmax.f32 %v363_v32, %v364_v40 }
  0xd8   : > { %v358_v49 = vmax.f32 %v356_v33, %v357_v43  ;;  %v370_v50 = vmax.f32 %v368_v34, %v369_v44  ;;  %v375_v51 = vmax.f32 %v373_v37, %v374_v46  ;;  %v380_v52 = vmax.f32 %v1242_v47, %v1239_v45  ;;  %v321_v53 = vpop.xlane.xlu1 %320 }
  0xd9   : > { %v318_v54 = vpop.xlane.xlu0 %317  ;;  %v410_v55 = vsub.f32 %v338_v62, %v365_v48  ;;  %v411_v56 = vsub.f32 %v339_v1, %v365_v48  ;;  %v1247_v7 = vadd.f32 %v1219_v59, %v321_v53 }
  0xda   : > { %v408_v57 = vsub.f32 %v336_v63, %v358_v49  ;;  %v409_v58 = vsub.f32 %v337_v3, %v358_v49  ;;  %v371_v60 = vrot.slane %v370_v50, 1  ;;  %v376_v61 = vrot.slane %v375_v51, 2 }
  0xdb   : > { %v381_v4 = vrot.slane %v380_v52, 4  ;;  %v428_v8 = vmul.f32 1.442695, %v410_v55  ;;  %v430_v11 = vmul.f32 1.442695, %v411_v56  ;;  %v1250_v13 = vadd.f32 %v1219_v59, %v318_v54 }
  0xdc   : > { %v424_v12 = vmul.f32 1.442695, %v408_v57  ;;  %v426_v16 = vmul.f32 1.442695, %v409_v58  ;;  %v372_v19 = vmax.f32 %v370_v50, %v371_v60  ;;  %v377_v20 = vmax.f32 %v375_v51, %v376_v61  ;;  %v327_v62 = vpop.xlane.xlu1 %326 }
  0xdd   : > { %v382_v21 = vmax.f32 %v380_v52, %v381_v4  ;;  %v324_v1 = vpop.xlane.xlu0 %323  ;;  %879 = vpow2.f32 %v428_v8  ;;  %v387_v63 = vmax.f32 %v1250_v13, %v1247_v7  ;;  %v1255_v3 = vadd.f32 %v1219_v59, %v327_v62 }
  0xde   : > { %v1258_v22 = vadd.f32 %v1219_v59, %v324_v1  ;;  %881 = vpow2.f32 %v430_v11  ;;  %v412_v25 = vsub.f32 %v340_v15, %v372_v19  ;;  %v413_v26 = vsub.f32 %v1226_v14, %v372_v19 }
  0xdf   : > { %v378_v27 = vrot.slane %v377_v20, 1  ;;  %883 = vpow2.f32 %v424_v12  ;;  %v383_v32 = vrot.slane %v382_v21, 2  ;;  %v388_v33 = vrot.slane %v387_v63, 4 }
  0xe0   : > { %v394_v34 = vmax.f32 %v1258_v22, %v1255_v3  ;;  %885 = vpow2.f32 %v426_v16  ;;  %v432_v37 = vmul.f32 1.442695, %v412_v25  ;;  %v434_v38 = vmul.f32 1.442695, %v413_v26  ;;  %v333_v40 = vpop.xlane.xlu1 %332 }
  0xe1   : > { %v379_v39 = vmax.f32 %v377_v20, %v378_v27  ;;  %v330_v43 = vpop.xlane.xlu0 %329  ;;  %v384_v44 = vmax.f32 %v382_v21, %v383_v32  ;;  %v389_v46 = vmax.f32 %v387_v63, %v388_v33  ;;  %v1264_v15 = vadd.f32 %v1219_v59, %v333_v40 }
  0xe2   : > { %v395_v48 = vrot.slane %v394_v34, 4  ;;  %887 = vpow2.f32 %v432_v37  ;;  %v1269_v50 = vadd.f32 %v1219_v59, %v330_v43 }
  0xe3   : > { %v414_v14 = vsub.f32 %v1234_v31, %v379_v39  ;;  %v415_v49 = vsub.f32 %v1231_v28, %v379_v39  ;;  %889 = vpow2.f32 %v434_v38  ;;  %v385_v51 = vrot.slane %v384_v44, 1 }
  0xe4   : > { %v390_v52 = vrot.slane %v389_v46, 2  ;;  %v396_v53 = vmax.f32 %v394_v34, %v395_v48  ;;  %v401_v56 = vmax.f32 %v1269_v50, %v1264_v15 }
  0xe5   : > { %v436_v54 = vmul.f32 1.442695, %v414_v14  ;;  %v438_v55 = vmul.f32 1.442695, %v415_v49  ;;  %v386_v57 = vmax.f32 %v384_v44, %v385_v51 }
  0xe6   : > { %v391_v58 = vmax.f32 %v389_v46, %v390_v52  ;;  %v397_v60 = vrot.slane %v396_v53, 2  ;;  %v402_v61 = vrot.slane %v401_v56, 4 }
  0xe7   : > { %891 = vpow2.f32 %v436_v54  ;;  %v1273_v31 = vpop.eup %879  ;;  %v416_v59 = vsub.f32 %v1242_v47, %v386_v57  ;;  %v417_v28 = vsub.f32 %v1239_v45, %v386_v57 }
  0xe8   : > { %893 = vpow2.f32 %v438_v55  ;;  %v392_v4 = vrot.slane %v391_v58, 1  ;;  %v1277_v8 = vpop.eup %881  ;;  %v398_v11 = vmax.f32 %v396_v53, %v397_v60  ;;  %v403_v12 = vmax.f32 %v401_v56, %v402_v61 }
  0xe9   : > { %v1279_v16 = vpop.eup %883  ;;  %v463_v19 = vadd.f32 %v1277_v8, %v1273_v31  ;;  %v440_v20 = vmul.f32 1.442695, %v416_v59  ;;  %v442_v21 = vmul.f32 1.442695, %v417_v28 }
  0xea   : > { %v393_v62 = vmax.f32 %v391_v58, %v392_v4  ;;  %v1283_v1 = vpop.eup %885  ;;  %v399_v63 = vrot.slane %v398_v11, 1  ;;  %v404_v25 = vrot.slane %v403_v12, 2 }
  0xeb   : > { %v464_v47 = vrot.slane %v463_v19, 4  ;;  %v456_v45 = vadd.f32 %v1283_v1, %v1279_v16  ;;  %895 = vpow2.f32 %v440_v20 }
  0xec   : > { %v418_v26 = vsub.f32 %v1250_v13, %v393_v62  ;;  %v1288_v27 = vpop.eup %887  ;;  %897 = vpow2.f32 %v442_v21  ;;  %v419_v32 = vsub.f32 %v1247_v7, %v393_v62  ;;  %v400_v33 = vmax.f32 %v398_v11, %v399_v63 }
  0xed   : > { %v405_v34 = vmax.f32 %v403_v12, %v404_v25  ;;  %v1291_v37 = vpop.eup %889  ;;  %v465_v38 = vadd.f32 %v464_v47, %v463_v19  ;;  %v457_v39 = vrot.slane %v456_v45, 4 }
  0xee   : > { %v444_v40 = vmul.f32 1.442695, %v418_v26  ;;  %v470_v43 = vadd.f32 %v1291_v37, %v1288_v27  ;;  %v446_v44 = vmul.f32 1.442695, %v419_v32  ;;  %v420_v46 = vsub.f32 %v1258_v22, %v400_v33 }
  0xef   : > { %v421_v13 = vsub.f32 %v1255_v3, %v400_v33  ;;  %v466_v48 = vrot.slane %v465_v38, 2  ;;  %v458_v14 = vadd.f32 %v457_v39, %v456_v45  ;;  %v406_v49 = vrot.slane %v405_v34, 1 }
  0xf0   : > { %899 = vpow2.f32 %v444_v40  ;;  %v471_v51 = vrot.slane %v470_v43, 4  ;;  %v448_v52 = vmul.f32 1.442695, %v420_v46 }
  0xf1   : > { %v1297_v7 = vpop.eup %891  ;;  %901 = vpow2.f32 %v446_v44  ;;  %v450_v53 = vmul.f32 1.442695, %v421_v13  ;;  %v467_v55 = vadd.f32 %v466_v48, %v465_v38  ;;  %v459_v56 = vrot.slane %v458_v14, 2 }
  0xf2   : > { %v1299_v54 = vpop.eup %893  ;;  %v407_v57 = vmax.f32 %v405_v34, %v406_v49  ;;  %v472_v58 = vadd.f32 %v471_v51, %v470_v43  ;;  %903 = vpow2.f32 %v448_v52 }
  0xf3   : > { %v477_v22 = vadd.f32 %v1299_v54, %v1297_v7  ;;  %v468_v3 = vrot.slane %v467_v55, 1  ;;  %v460_v60 = vadd.f32 %v459_v56, %v458_v14  ;;  %905 = vpow2.f32 %v450_v53 }
  0xf4   : > { %v422_v61 = vsub.f32 %v1269_v50, %v407_v57  ;;  %v473_v59 = vrot.slane %v472_v58, 2  ;;  %v423_v4 = vsub.f32 %v1264_v15, %v407_v57 }
  0xf5   : > { %v478_v28 = vrot.slane %v477_v22, 4  ;;  %v1305_v11 = vpop.eup %895  ;;  %v469_v12 = vadd.f32 %v468_v3, %v467_v55  ;;  %v461_v19 = vrot.slane %v460_v60, 1 }
  0xf6   : > { %v452_v20 = vmul.f32 1.442695, %v422_v61  ;;  %v1307_v21 = vpop.eup %897  ;;  %v474_v62 = vadd.f32 %v473_v59, %v472_v58  ;;  %v454_v25 = vmul.f32 1.442695, %v423_v4 }
  0xf7   : > { %v479_v63 = vadd.f32 %v478_v28, %v477_v22  ;;  %907 = vrcp.f32 %v469_v12  ;;  %v462_v47 = vadd.f32 %v461_v19, %v460_v60  ;;  %v484_v45 = vadd.f32 %v1307_v21, %v1305_v11 }
  0xf8   : > { %v475_v50 = vrot.slane %v474_v62, 1  ;;  %909 = vpow2.f32 %v452_v20 }
  0xf9   : > { %v480_v26 = vrot.slane %v479_v63, 2  ;;  %911 = vrcp.f32 %v462_v47  ;;  %v485_v15 = vrot.slane %v484_v45, 4 }
  0xfa   : > { %v1311_v32 = vpop.eup %899  ;;  %v476_v34 = vadd.f32 %v475_v50, %v474_v62  ;;  %913 = vpow2.f32 %v454_v25 }
  0xfb   : > { %v1313_v33 = vpop.eup %901  ;;  %v481_v38 = vadd.f32 %v480_v26, %v479_v63  ;;  %v486_v39 = vadd.f32 %v485_v15, %v484_v45 }
  0xfc   : > { %v491_v40 = vadd.f32 %v1313_v33, %v1311_v32  ;;  %v1317_v43 = vpop.eup %903  ;;  %915 = vrcp.f32 %v476_v34 }
  0xfd   : > { %v482_v44 = vrot.slane %v481_v38, 1  ;;  %v1319_v46 = vpop.eup %905  ;;  %v487_v13 = vrot.slane %v486_v39, 2 }
  0xfe   : > { %v492_v48 = vrot.slane %v491_v40, 4  ;;  %v498_v49 = vadd.f32 %v1319_v46, %v1317_v43 }
  0xff   : > { %v483_v14 = vadd.f32 %v482_v44, %v481_v38  ;;  %v488_v51 = vadd.f32 %v487_v13, %v486_v39 }
 0x100   : > { %v493_v52 = vadd.f32 %v492_v48, %v491_v40  ;;  %v499_v53 = vrot.slane %v498_v49, 4 }
 0x101   : > { %917 = vrcp.f32 %v483_v14  ;;  %v908_v55 = vpop.eup %907  ;;  %v489_v56 = vrot.slane %v488_v51, 1 }
 0x102   : > { %v494_v57 = vrot.slane %v493_v52, 2  ;;  %v1323_v58 = vpop.eup %909  ;;  %v500_v22 = vadd.f32 %v499_v53, %v498_v49  ;;  %v522_v60 = vmul.f32 %v908_v55, %v1273_v31  ;;  %v523_v4 = vmul.f32 %v908_v55, %v1277_v8 }
 0x103   : > { %v912_v3 = vpop.eup %911  ;;  %v490_v61 = vadd.f32 %v489_v56, %v488_v51 }
 0x104   : > { %v495_v59 = vadd.f32 %v494_v57, %v493_v52  ;;  %v1326_v28 = vpop.eup %913  ;;  %v520_v12 = vmul.f32 %v912_v3, %v1279_v16  ;;  %v521_v19 = vmul.f32 %v912_v3, %v1283_v1  ;;  %v501_v62 = vrot.slane %v500_v22, 2 }
 0x105   : > { %919 = vrcp.f32 %v490_v61  ;;  %v505_v63 = vadd.f32 %v1326_v28, %v1323_v58  ;;  %v538_v47 = vmul.f32 %v522_v60, %v1125_v0  ;;  %v539_v8 = vmul.f32 %v523_v4, %v1136_v5 }
 0x106   : > { %v496_v20 = vrot.slane %v495_v59, 1  ;;  %v916_v25 = vpop.eup %915  ;;  %v502_v26 = vadd.f32 %v501_v62, %v500_v22  ;;  %v536_v1 = vmul.f32 %v520_v12, %v1131_v2  ;;  %v537_v15 = vmul.f32 %v521_v19, %v1139_v6 }
 0x107   : > { %v524_v31 = vmul.f32 %v916_v25, %v1288_v27  ;;  %v525_v45 = vmul.f32 %v916_v25, %v1291_v37  ;;  %v506_v16 = vrot.slane %v505_v63, 4  ;;  %v561_v40 = vsel %vm285_vm0, %v538_v47, 0.0 }
 0x108   : > { %v497_v50 = vadd.f32 %v496_v20, %v495_v59  ;;  %v503_v38 = vrot.slane %v502_v26, 1  ;;  %v562_v37 = vsel %vm285_vm0, %v539_v8, 0.0  ;;  %v552_v2 = vsel %vm285_vm0, %v536_v1, 0.0 }
 0x109   : > { %v507_v39 = vadd.f32 %v506_v16, %v505_v63  ;;  %v540_v0 = vmul.f32 %v524_v31, %v1147_v10  ;;  %v541_v27 = vmul.f32 %v525_v45, %v1144_v9  ;;  %v553_v6 = vsel %vm285_vm0, %v537_v15, 0.0 }
 0x10a   : > { %921 = vrcp.f32 %v497_v50  ;;  %v504_v13 = vadd.f32 %v503_v38, %v502_v26  ;;  %v563_v51 = vadd.f32 %v562_v37, %v561_v40  ;;  %v554_v53 = vadd.f32 %v553_v6, %v552_v2 }
 0x10b   : > { %v918_v34 = vpop.eup %917  ;;  %v508_v48 = vrot.slane %v507_v39, 2  ;;  %v570_v9 = vsel %vm285_vm0, %v540_v0, 0.0  ;;  %v571_v52 = vsel %vm285_vm0, %v541_v27, 0.0 }
 0x10c   : > { %v526_v5 = vmul.f32 %v918_v34, %v1297_v7  ;;  %v527_v44 = vmul.f32 %v918_v34, %v1299_v54  ;;  %923 = vrcp.f32 %v504_v13  ;;  %v572_v22 = vadd.f32 %v571_v52, %v570_v9 }
 0x10d   : > { %v509_v7 = vadd.f32 %v508_v48, %v507_v39  ;;  %v564_v4 = vrot.slane %v563_v51, 4  ;;  %v555_v12 = vrot.slane %v554_v53, 4 }
 0x10e   : > { %v542_v14 = vmul.f32 %v526_v5, %v1159_v18  ;;  %v543_v49 = vmul.f32 %v527_v44, %v1156_v17 }
 0x10f   : > { %v920_v10 = vpop.eup %919  ;;  %v510_v18 = vrot.slane %v509_v7, 1  ;;  %v565_v31 = vadd.f32 %v564_v4, %v563_v51  ;;  %v556_v45 = vadd.f32 %v555_v12, %v554_v53 }
 0x110   : > { %v579_v54 = vsel %vm285_vm0, %v542_v14, 0.0  ;;  %v580_v55 = vsel %vm285_vm0, %v543_v49, 0.0  ;;  %v528_v56 = vmul.f32 %v920_v10, %v1305_v11  ;;  %v529_v57 = vmul.f32 %v920_v10, %v1307_v21 }
 0x111   : > { %v581_v3 = vadd.f32 %v580_v55, %v579_v54  ;;  %v511_v61 = vadd.f32 %v510_v18, %v509_v7  ;;  %v573_v21 = vrot.slane %v572_v22, 4  ;;  %v557_v40 = vrot.slane %v556_v45, 2 }
 0x112   : > { %v544_v17 = vmul.f32 %v528_v56, %v1169_v24  ;;  %v545_v60 = vmul.f32 %v529_v57, %v1166_v23 }
 0x113   : > { %925 = vrcp.f32 %v511_v61  ;;  %v582_v25 = vrot.slane %v581_v3, 4  ;;  %v574_v16 = vadd.f32 %v573_v21, %v572_v22  ;;  %v558_v6 = vadd.f32 %v557_v40, %v556_v45 }
 0x114   : > { %v922_v59 = vpop.eup %921  ;;  %v588_v19 = vsel %vm285_vm0, %v544_v17, 0.0  ;;  %v589_v20 = vsel %vm285_vm0, %v545_v60, 0.0 }
 0x115   : > { %v530_v62 = vmul.f32 %v922_v59, %v1311_v32  ;;  %v531_v11 = vmul.f32 %v922_v59, %v1313_v33  ;;  %v590_v63 = vadd.f32 %v589_v20, %v588_v19  ;;  %v583_v34 = vadd.f32 %v582_v25, %v581_v3 }
 0x116   : > { %v924_v47 = vpop.eup %923  ;;  %v559_v55 = vrot.slane %v558_v6, 1 }
 0x117   : > { %v546_v24 = vmul.f32 %v530_v62, %v1179_v30  ;;  %v547_v23 = vmul.f32 %v531_v11, %v1176_v29  ;;  %v591_v50 = vrot.slane %v590_v63, 4  ;;  %v532_v26 = vmul.f32 %v924_v47, %v1317_v43 }
 0x118   : > { %v533_v32 = vmul.f32 %v924_v47, %v1319_v46  ;;  %v566_v29 = vrot.slane %v565_v31, 2  ;;  %v575_v43 = vrot.slane %v574_v16, 2  ;;  %v584_v44 = vrot.slane %v583_v34, 2 }
 0x119   : > { %v597_v8 = vsel %vm285_vm0, %v546_v24, 0.0  ;;  %v598_v33 = vsel %vm285_vm0, %v547_v23, 0.0  ;;  %v548_v15 = vmul.f32 %v532_v26, %v1189_v36  ;;  %v592_v38 = vadd.f32 %v591_v50, %v590_v63 }
 0x11a   : > { %v599_v1 = vadd.f32 %v598_v33, %v597_v8  ;;  %v549_v30 = vmul.f32 %v533_v32, %v1186_v35  ;;  %v567_v2 = vadd.f32 %v566_v29, %v565_v31  ;;  %v576_v51 = vadd.f32 %v575_v43, %v574_v16  ;;  %v807_v32 = vld [vmem:[%s1403_s4] ss:$0 sm:$0xff] }
 0x11b   : > { %v606_v0 = vsel %vm285_vm0, %v548_v15, 0.0  ;;  %v593_v35 = vrot.slane %v592_v38, 2  ;;  %v585_v9 = vadd.f32 %v584_v44, %v583_v34  ;;  %v560_v60 = vadd.f32 %v559_v55, %v558_v6 }
 0x11c   : > { %v600_v39 = vrot.slane %v599_v1, 4  ;;  %v607_v27 = vsel %vm285_vm0, %v549_v30, 0.0  ;;  %v568_v7 = vrot.slane %v567_v2, 1  ;;  %v577_v18 = vrot.slane %v576_v51, 1 }
 0x11d   : > { %v608_v46 = vadd.f32 %v607_v27, %v606_v0  ;;  %v926_v5 = vpop.eup %925  ;;  %v594_v53 = vadd.f32 %v593_v35, %v592_v38  ;;  %v586_v22 = vrot.slane %v585_v9, 1 }
 0x11e   : > { %v601_v37 = vadd.f32 %v600_v39, %v599_v1  ;;  %v534_v13 = vmul.f32 %v926_v5, %v1323_v58  ;;  %v535_v36 = vmul.f32 %v926_v5, %v1326_v28  ;;  %v578_v4 = vadd.f32 %v577_v18, %v576_v51 }
 0x11f   : > { %v609_v14 = vrot.slane %v608_v46, 4  ;;  %v587_v19 = vadd.f32 %v586_v22, %v585_v9 }
 0x120   : > { %v602_v48 = vrot.slane %v601_v37, 2  ;;  %v550_v49 = vmul.f32 %v534_v13, %v1199_v42  ;;  %v551_v10 = vmul.f32 %v535_v36, %v1196_v41  ;;  %v595_v42 = vrot.slane %v594_v53, 1 }
 0x121   : > { %v610_v52 = vadd.f32 %v609_v14, %v608_v46  ;;  %v569_v41 = vadd.f32 %v568_v7, %v567_v2 }
 0x122   : > { %v615_v54 = vsel %vm285_vm0, %v550_v49, 0.0  ;;  %v616_v58 = vsel %vm285_vm0, %v551_v10, 0.0  ;;  %v603_v28 = vadd.f32 %v602_v48, %v601_v37  ;;  %v596_v62 = vadd.f32 %v595_v42, %v594_v53 }
 0x123   : > { %v611_v56 = vrot.slane %v610_v52, 2  ;;  %v617_v57 = vadd.f32 %v616_v58, %v615_v54  ;;  %v644_v63 = vsel %vm643_vm2, %v569_v41, %v560_v60 }
 0x124   : > { %v604_v61 = vrot.slane %v603_v28, 1  ;;  %v646_v24 = vsel %vm645_vm3, %v578_v4, %v644_v63 }
 0x125   : > { %v612_v17 = vadd.f32 %v611_v56, %v610_v52  ;;  %v618_v3 = vrot.slane %v617_v57, 4  ;;  %v648_v47 = vsel %vm647_vm4, %v587_v19, %v646_v24 }
 0x126   : > { %v605_v11 = vadd.f32 %v604_v61, %v603_v28  ;;  %v650_v31 = vsel %vm649_vm5, %v596_v62, %v648_v47 }
 0x127   : > { %v619_v59 = vadd.f32 %v618_v3, %v617_v57  ;;  %v613_v12 = vrot.slane %v612_v17, 1 }
 0x128   : > { %v652_v50 = vsel %vm651_vm6, %v605_v11, %v650_v31 }
 0x129   : > { %v620_v20 = vrot.slane %v619_v59, 2  ;;  %v614_v25 = vadd.f32 %v613_v12, %v612_v17 }
 0x12b   : > { %v621_v21 = vadd.f32 %v620_v20, %v619_v59  ;;  %v654_v8 = vsel %vm653_vm7, %v614_v25, %v652_v50 }
 0x12d   : > { %v622_v23 = vrot.slane %v621_v21, 1 }
 0x12f   : > { %v623_v45 = vadd.f32 %v622_v23, %v621_v21 }
 0x131   : > { %v656_v26 = vsel %vm655_vm8, %v623_v45, %v654_v8 }
 0x132   : > { %827 = vmatmul.mubr.msk.f32.vlgmr.msra.gmra.mrb[0].mxu0 %vm285_vm0, %v656_v26 }
 0x205   : > { %v725_v33 = vpop.f32.mrb[0].mxu0 }
 0x206   : > { %v726_v16 = vadd.f32 %v807_v32, %v725_v33  ;;  %v828_v1 = vpop.f32.mrb[1].mxu0 }
 0x208   : > { %730 = vst.msk [vmem:[%s245_s6] sm:$0xff] %vm729_vm9, %v726_v16 }
 0x209 PF: > { %p16_p8 = scmp.ge.s32.totalorder %s1054_s24, 4   ;;  %s1408_s20 = smov %s983_s21 }
 0x20a   : > { %s1409_s21 = smov %s987_s22  ;;  %s1410_s22 = smov %s1064_s27 }
 0x20b   : > { %s1411_s23 = smov %s1054_s24  ;;  %18 = sbr.rel (!%p16_p8) target bundleno = 5 (0x5), region = 80 }
 0x212   :  { %750 = vsyncpa [#allocation4], 1 }
 0x213   :  { %752 = vsyncpa [#allocation4 + $0x1], 1 }

</bundles_post_ra>
